<compile_context>
chip_gen: v5e
topology: v5e:2x2
jax: 0.10.0
libtpu: 0.0.40
codegen_flags: <defaults>
</compile_context>

<pallas_src>
import jax
import jax.numpy as jnp
from jax.experimental import pallas as pl
from jax.experimental.pallas import tpu as pltpu


def _make_coupling_kernel(n_mid: int, reverse: bool):
    """Build a kernel for a fixed number of mid layers and direction."""

    def kernel(*refs):
        # refs = [x, w_in, b_in, (w_mid, b_mid) * n_mid, w_out, b_out, out]
        x_ref, w_in_ref, b_in_ref = refs[0], refs[1], refs[2]
        mids = refs[3:3 + 2 * n_mid]
        w_out_ref = refs[3 + 2 * n_mid]
        b_out_ref = refs[4 + 2 * n_mid]
        out_ref = refs[-1]

        x = x_ref[...]                                        # (TB, W) f32

        # in_block: Linear (bf16 MXU, f32 acc) + ReLU.  W_in_exp has zero rows
        # at the `on` positions, so this equals off @ W_in + b_in exactly.
        h = jnp.dot(x.astype(jnp.bfloat16), w_in_ref[...],
                    preferred_element_type=jnp.float32) + b_in_ref[...]
        h = jnp.maximum(h, 0.0)

        # mid_block: (hidden - 1) x [Linear + ReLU]
        for i in range(n_mid):
            h = jnp.dot(h.astype(jnp.bfloat16), mids[2 * i][...],
                        preferred_element_type=jnp.float32) + mids[2 * i + 1][...]
            h = jnp.maximum(h, 0.0)

        # out_block: Linear -> shift already scattered onto the interleaved
        # layout (exact zeros at `off` columns), so the additive coupling and
        # the re-interleave are a single elementwise add/sub + full-width store.
        shift = jnp.dot(h.astype(jnp.bfloat16), w_out_ref[...],
                        preferred_element_type=jnp.float32) + b_out_ref[...]

        if reverse:
            out_ref[...] = (x - shift).astype(out_ref.dtype)
        else:
            out_ref[...] = (x + shift).astype(out_ref.dtype)

    return kernel


def init_coupling_params(key, in_out_dim, mid_dim, hidden):
    """Deterministic PyTorch-Linear-style init (U[-1/sqrt(fan_in), 1/sqrt(fan_in)]).

    Weights are stored (in_features, out_features) so h @ W + b == x @ weight.T + bias.
    """
    half = in_out_dim // 2
    keys = jax.random.split(key, 2 * (hidden + 1))

    def linear(kw, kb, fan_in, fan_out):
        bound = 1.0 / float(fan_in) ** 0.5
        w = jax.random.uniform(kw, (fan_in, fan_out), jnp.float32, -bound, bound)
        b = jax.random.uniform(kb, (1, fan_out), jnp.float32, -bound, bound)
        return w, b

    w_in, b_in = linear(keys[0], keys[1], half, mid_dim)
    mids = []
    for i in range(hidden - 1):
        mids.append(linear(keys[2 + 2 * i], keys[3 + 2 * i], mid_dim, mid_dim))
    w_out, b_out = linear(keys[-2], keys[-1], mid_dim, half)
    return dict(w_in=w_in, b_in=b_in, mids=mids, w_out=w_out, b_out=b_out)


def prepare_coupling_params(params, in_out_dim, mask_config):
    """One-time weight prep (call OUTSIDE the sampling/training loop):

    * Scatter-expand the first/last Linear so the even/odd de/interleave is
      fused into the matmuls (see header).
    * Cast all weight matrices to bf16 (MXU-native, halves weight DMA/VMEM).
      Biases stay f32 and are added to the f32 accumulator.
    """
    W = in_out_dim
    half = W // 2
    # PyTorch: x.reshape(B, half, 2); [:, :, 0] = even columns, [:, :, 1] = odd.
    if mask_config:
        on_idx = jnp.arange(half) * 2          # transform the even columns
        off_idx = jnp.arange(half) * 2 + 1
    else:
        off_idx = jnp.arange(half) * 2
        on_idx = jnp.arange(half) * 2 + 1

    w_in, b_in = params["w_in"], params["b_in"]
    w_out, b_out = params["w_out"], params["b_out"]
    mid = w_in.shape[1]

    w_in_exp = jnp.zeros((W, mid), jnp.float32).at[off_idx].set(w_in)
    w_out_exp = jnp.zeros((mid, W), jnp.float32).at[:, on_idx].set(w_out)
    b_out_exp = jnp.zeros((W,), jnp.float32).at[on_idx].set(b_out[0]).reshape(1, W)

    bf16 = jnp.bfloat16
    flat = [w_in_exp.astype(bf16), b_in]
    for (w, b) in params["mids"]:
        flat += [w.astype(bf16), b]
    flat += [w_out_exp.astype(bf16), b_out_exp]
    flat = [jax.block_until_ready(a) for a in flat]          # materialize once
    return dict(flat=flat, n_mid=len(params["mids"]), in_out_dim=W)


def _pick_batch_tile(B):
    """Batch-tile size: a multiple of 8 that evenly divides B, targeting >=4
    grid steps (pipelining + dual-TC split on v7x) while capping tiles at
    2048 rows (per-step overhead is well amortized before that)."""
    if B <= 8 or B % 8 != 0:
        return B                       # tiny / ragged batch: single full tile
    target = min(2048, max(B // 4, 8))
    t = (target // 8) * 8
    while t >= 8:
        if B % t == 0:
            return t
        t -= 8
    return B


def coupling_forward(x, prepared, reverse=False):
    B, W = x.shape
    assert W == prepared["in_out_dim"]
    flat = prepared["flat"]
    n_mid = prepared["n_mid"]

    TB = _pick_batch_tile(B)
    grid = (pl.cdiv(B, TB),)

    # x / y are tiled over the batch dim -> software pipelining across tiles.
    io_spec = pl.BlockSpec((TB, W), lambda i: (i, 0))
    # Constant block index across the grid -> weights stay resident in VMEM.
    resident_specs = [pl.BlockSpec(a.shape, lambda i: (0, 0)) for a in flat]

    kernel = _make_coupling_kernel(n_mid, reverse)
    return pl.pallas_call(
        kernel,
        out_shape=jax.ShapeDtypeStruct((B, W), x.dtype),
        grid=grid,
        in_specs=[io_spec] + resident_specs,
        out_specs=io_spec,
        compiler_params=pltpu.CompilerParams(
            dimension_semantics=("parallel",),   # batch tiles are independent
        ),
    )(x, *flat)


def coupling_ref(x, params, mask_config, reverse=False, use_bf16=False):
    """Pure-JAX reference matching the PyTorch module (de/interleave included).

    use_bf16=True mirrors the kernel's bf16-matmul / f32-accumulate numerics.
    """
    B, W = x.shape
    half = W // 2
    x3 = x.reshape(B, half, 2)
    if mask_config:
        on, off = x3[:, :, 0], x3[:, :, 1]
    else:
        off, on = x3[:, :, 0], x3[:, :, 1]

    def mm(a, w):
        if use_bf16:
            return jnp.dot(a.astype(jnp.bfloat16), w.astype(jnp.bfloat16),
                           preferred_element_type=jnp.float32)
        return a @ w

    h = jnp.maximum(mm(off, params["w_in"]) + params["b_in"], 0.0)
    for (w, b) in params["mids"]:
        h = jnp.maximum(mm(h, w) + b, 0.0)
    shift = mm(h, params["w_out"]) + params["b_out"]
    on = on - shift if reverse else on + shift
    if mask_config:
        y = jnp.stack((on, off), axis=2)
    else:
        y = jnp.stack((off, on), axis=2)
    return y.reshape(B, W)


if __name__ == "__main__":
    # Small, MXU/vreg-aligned shapes: in_out_dim=256 (half=128), mid_dim=128,
    # hidden=3 (=> 2 mid layers), batch=256 -> TB=64 -> grid=(4,).
    B, in_out_dim, mid_dim, hidden, mask_config = 256, 256, 128, 3, 1

    key = jax.random.PRNGKey(0)
    kx, kp = jax.random.split(key)
    x = jax.random.normal(kx, (B, in_out_dim), dtype=jnp.float32)
    params = init_coupling_params(kp, in_out_dim, mid_dim, hidden)
    prepared = prepare_coupling_params(params, in_out_dim, mask_config)

    # Forward (sampling direction).
    out = jax.block_until_ready(coupling_forward(x, prepared, reverse=False))
    assert out.shape == (B, in_out_dim)

    # Tight check vs a reference with the same bf16-matmul / f32-acc numerics.
    ref_bf16 = coupling_ref(x, params, mask_config, reverse=False, use_bf16=True)
    assert jnp.allclose(out, ref_bf16, atol=2e-3, rtol=2e-3), "mismatch vs bf16 reference"

    # Loose check vs the full-f32 PyTorch-equivalent reference.
    ref_f32 = coupling_ref(x, params, mask_config, reverse=False, use_bf16=False)
    assert jnp.allclose(out, ref_f32, atol=5e-2, rtol=5e-2), "mismatch vs f32 reference"

    # The untouched half must pass through exactly (shift is exactly 0 there).
    off_cols = jnp.arange(in_out_dim // 2) * 2 + (1 if mask_config else 0)
    assert jnp.array_equal(out[:, off_cols], x[:, off_cols]), "off passthrough not exact"

    # Additive coupling is invertible: reverse pass reconstructs x.
    x_back = jax.block_until_ready(coupling_forward(out, prepared, reverse=True))
    assert jnp.allclose(x_back, x, atol=1e-3, rtol=1e-3), "reverse pass mismatch"

    print("KERNEL_OK")
</pallas_src>

<mosaic_0001>
module attributes {stable_mosaic.version = 11 : i64} {
  func.func @kernel(%arg0: i32, %arg1: memref<64x256xf32, #tpu.memory_space<vmem>>, %arg2: memref<256x128xbf16, #tpu.memory_space<vmem>>, %arg3: memref<1x128xf32, #tpu.memory_space<vmem>>, %arg4: memref<128x128xbf16, #tpu.memory_space<vmem>>, %arg5: memref<1x128xf32, #tpu.memory_space<vmem>>, %arg6: memref<128x128xbf16, #tpu.memory_space<vmem>>, %arg7: memref<1x128xf32, #tpu.memory_space<vmem>>, %arg8: memref<128x256xbf16, #tpu.memory_space<vmem>>, %arg9: memref<1x256xf32, #tpu.memory_space<vmem>>, %arg10: memref<64x256xf32, #tpu.memory_space<vmem>>) attributes {dimension_semantics = [#tpu.dimension_semantics<parallel>], iteration_bounds = array<i64: 4>, scalar_prefetch = 0 : i64, scratch_operands = 0 : i64, tpu.core_type = #tpu.core_type<tc>, window_params = [{transform_indices = @transform_0, window_bounds = array<i64: 64, 256>}, {pipeline_mode = #tpu.pipeline_mode<synchronous>, transform_indices = @transform_1, window_bounds = array<i64: 256, 128>}, {pipeline_mode = #tpu.pipeline_mode<synchronous>, transform_indices = @transform_2, window_bounds = array<i64: 1, 128>}, {pipeline_mode = #tpu.pipeline_mode<synchronous>, transform_indices = @transform_3, window_bounds = array<i64: 128, 128>}, {pipeline_mode = #tpu.pipeline_mode<synchronous>, transform_indices = @transform_4, window_bounds = array<i64: 1, 128>}, {pipeline_mode = #tpu.pipeline_mode<synchronous>, transform_indices = @transform_5, window_bounds = array<i64: 128, 128>}, {pipeline_mode = #tpu.pipeline_mode<synchronous>, transform_indices = @transform_6, window_bounds = array<i64: 1, 128>}, {pipeline_mode = #tpu.pipeline_mode<synchronous>, transform_indices = @transform_7, window_bounds = array<i64: 128, 256>}, {pipeline_mode = #tpu.pipeline_mode<synchronous>, transform_indices = @transform_8, window_bounds = array<i64: 1, 256>}, {transform_indices = @transform_9, window_bounds = array<i64: 64, 256>}]} {
    %c0 = arith.constant 0 : index
    %c0_0 = arith.constant 0 : index
    %0 = vector.load %arg1[%c0, %c0_0] : memref<64x256xf32, #tpu.memory_space<vmem>>, vector<64x256xf32>
    %1 = arith.truncf %0 : vector<64x256xf32> to vector<64x256xbf16>
    %c0_1 = arith.constant 0 : index
    %c0_2 = arith.constant 0 : index
    %2 = vector.load %arg2[%c0_1, %c0_2] : memref<256x128xbf16, #tpu.memory_space<vmem>>, vector<256x128xbf16>
    %cst = arith.constant dense<0.000000e+00> : vector<64x128xf32>
    %3 = tpu.matmul %1, %2, %cst {dimension_numbers = #tpu.dot_dimension_numbers<[1], [0], [0], [1], [0, 0, 1, 1], [], []>} : vector<64x256xbf16>, vector<256x128xbf16>, vector<64x128xf32> -> vector<64x128xf32>
    %c0_3 = arith.constant 0 : index
    %c0_4 = arith.constant 0 : index
    %4 = vector.load %arg3[%c0_3, %c0_4] : memref<1x128xf32, #tpu.memory_space<vmem>>, vector<1x128xf32>
    %5 = vector.broadcast %4 : vector<1x128xf32> to vector<64x128xf32>
    %6 = arith.addf %3, %5 : vector<64x128xf32>
    %cst_5 = arith.constant 0.000000e+00 : f32
    %7 = vector.broadcast %cst_5 : f32 to vector<64x128xf32>
    %8 = arith.maximumf %6, %7 : vector<64x128xf32>
    %9 = arith.truncf %8 : vector<64x128xf32> to vector<64x128xbf16>
    %c0_6 = arith.constant 0 : index
    %c0_7 = arith.constant 0 : index
    %10 = vector.load %arg4[%c0_6, %c0_7] : memref<128x128xbf16, #tpu.memory_space<vmem>>, vector<128x128xbf16>
    %cst_8 = arith.constant dense<0.000000e+00> : vector<64x128xf32>
    %11 = tpu.matmul %9, %10, %cst_8 {dimension_numbers = #tpu.dot_dimension_numbers<[1], [0], [0], [1], [0, 0, 1, 1], [], []>} : vector<64x128xbf16>, vector<128x128xbf16>, vector<64x128xf32> -> vector<64x128xf32>
    %c0_9 = arith.constant 0 : index
    %c0_10 = arith.constant 0 : index
    %12 = vector.load %arg5[%c0_9, %c0_10] : memref<1x128xf32, #tpu.memory_space<vmem>>, vector<1x128xf32>
    %13 = vector.broadcast %12 : vector<1x128xf32> to vector<64x128xf32>
    %14 = arith.addf %11, %13 : vector<64x128xf32>
    %cst_11 = arith.constant 0.000000e+00 : f32
    %15 = vector.broadcast %cst_11 : f32 to vector<64x128xf32>
    %16 = arith.maximumf %14, %15 : vector<64x128xf32>
    %17 = arith.truncf %16 : vector<64x128xf32> to vector<64x128xbf16>
    %c0_12 = arith.constant 0 : index
    %c0_13 = arith.constant 0 : index
    %18 = vector.load %arg6[%c0_12, %c0_13] : memref<128x128xbf16, #tpu.memory_space<vmem>>, vector<128x128xbf16>
    %cst_14 = arith.constant dense<0.000000e+00> : vector<64x128xf32>
    %19 = tpu.matmul %17, %18, %cst_14 {dimension_numbers = #tpu.dot_dimension_numbers<[1], [0], [0], [1], [0, 0, 1, 1], [], []>} : vector<64x128xbf16>, vector<128x128xbf16>, vector<64x128xf32> -> vector<64x128xf32>
    %c0_15 = arith.constant 0 : index
    %c0_16 = arith.constant 0 : index
    %20 = vector.load %arg7[%c0_15, %c0_16] : memref<1x128xf32, #tpu.memory_space<vmem>>, vector<1x128xf32>
    %21 = vector.broadcast %20 : vector<1x128xf32> to vector<64x128xf32>
    %22 = arith.addf %19, %21 : vector<64x128xf32>
    %cst_17 = arith.constant 0.000000e+00 : f32
    %23 = vector.broadcast %cst_17 : f32 to vector<64x128xf32>
    %24 = arith.maximumf %22, %23 : vector<64x128xf32>
    %25 = arith.truncf %24 : vector<64x128xf32> to vector<64x128xbf16>
    %c0_18 = arith.constant 0 : index
    %c0_19 = arith.constant 0 : index
    %26 = vector.load %arg8[%c0_18, %c0_19] : memref<128x256xbf16, #tpu.memory_space<vmem>>, vector<128x256xbf16>
    %cst_20 = arith.constant dense<0.000000e+00> : vector<64x256xf32>
    %27 = tpu.matmul %25, %26, %cst_20 {dimension_numbers = #tpu.dot_dimension_numbers<[1], [0], [0], [1], [0, 0, 1, 1], [], []>} : vector<64x128xbf16>, vector<128x256xbf16>, vector<64x256xf32> -> vector<64x256xf32>
    %c0_21 = arith.constant 0 : index
    %c0_22 = arith.constant 0 : index
    %28 = vector.load %arg9[%c0_21, %c0_22] : memref<1x256xf32, #tpu.memory_space<vmem>>, vector<1x256xf32>
    %29 = vector.broadcast %28 : vector<1x256xf32> to vector<64x256xf32>
    %30 = arith.addf %27, %29 : vector<64x256xf32>
    %31 = arith.addf %0, %30 : vector<64x256xf32>
    %c0_23 = arith.constant 0 : index
    %c0_24 = arith.constant 0 : index
    %32 = vector.load %arg10[%c0_23, %c0_24] : memref<64x256xf32, #tpu.memory_space<vmem>>, vector<64x256xf32>
    tpu.vector_store %arg10[%c0_23, %c0_24], %31 {strides = array<i32>} : memref<64x256xf32, #tpu.memory_space<vmem>>, vector<64x256xf32>,
    return
  }
  func.func @transform_0(%arg0: i32) -> (i32, i32) {
    %c0_i32 = arith.constant 0 : i32
    %c0_i32_0 = arith.constant 0 : i32
    return %arg0, %c0_i32 : i32, i32
  }
  func.func @transform_1(%arg0: i32) -> (i32, i32) {
    %c0_i32 = arith.constant 0 : i32
    %c0_i32_0 = arith.constant 0 : i32
    %c0_i32_1 = arith.constant 0 : i32
    return %c0_i32, %c0_i32_0 : i32, i32
  }
  func.func @transform_2(%arg0: i32) -> (i32, i32) {
    %c0_i32 = arith.constant 0 : i32
    %c0_i32_0 = arith.constant 0 : i32
    %c0_i32_1 = arith.constant 0 : i32
    return %c0_i32, %c0_i32_0 : i32, i32
  }
  func.func @transform_3(%arg0: i32) -> (i32, i32) {
    %c0_i32 = arith.constant 0 : i32
    %c0_i32_0 = arith.constant 0 : i32
    %c0_i32_1 = arith.constant 0 : i32
    return %c0_i32, %c0_i32_0 : i32, i32
  }
  func.func @transform_4(%arg0: i32) -> (i32, i32) {
    %c0_i32 = arith.constant 0 : i32
    %c0_i32_0 = arith.constant 0 : i32
    %c0_i32_1 = arith.constant 0 : i32
    return %c0_i32, %c0_i32_0 : i32, i32
  }
  func.func @transform_5(%arg0: i32) -> (i32, i32) {
    %c0_i32 = arith.constant 0 : i32
    %c0_i32_0 = arith.constant 0 : i32
    %c0_i32_1 = arith.constant 0 : i32
    return %c0_i32, %c0_i32_0 : i32, i32
  }
  func.func @transform_6(%arg0: i32) -> (i32, i32) {
    %c0_i32 = arith.constant 0 : i32
    %c0_i32_0 = arith.constant 0 : i32
    %c0_i32_1 = arith.constant 0 : i32
    return %c0_i32, %c0_i32_0 : i32, i32
  }
  func.func @transform_7(%arg0: i32) -> (i32, i32) {
    %c0_i32 = arith.constant 0 : i32
    %c0_i32_0 = arith.constant 0 : i32
    %c0_i32_1 = arith.constant 0 : i32
    return %c0_i32, %c0_i32_0 : i32, i32
  }
  func.func @transform_8(%arg0: i32) -> (i32, i32) {
    %c0_i32 = arith.constant 0 : i32
    %c0_i32_0 = arith.constant 0 : i32
    %c0_i32_1 = arith.constant 0 : i32
    return %c0_i32, %c0_i32_0 : i32, i32
  }
  func.func @transform_9(%arg0: i32) -> (i32, i32) {
    %c0_i32 = arith.constant 0 : i32
    %c0_i32_0 = arith.constant 0 : i32
    return %arg0, %c0_i32 : i32, i32
  }
}

</mosaic_0001>

<bundles_post_ra>
// kernel: tpu_custom_call.1
= control target key start
LH: loop header
LB: loop body
LE: loop exit
PB: predicated region body
PF: predicated region fallthrough
CT: control target
= control target key end

     0   :  { %s2246_s0 = inlined_call_operand.hbm [shape: f32[256,256], index: 0, kind: input, shape index: {}]   ;;  %s2247_s1 = inlined_call_operand.hbm [shape: bf16[256,128], index: 1, kind: input, shape index: {}]   ;;  %s2248_s2 = inlined_call_operand.vmem [shape: f32[1,128], index: 2, kind: input, shape index: {}]   ;;  %s2249_s3 = inlined_call_operand.hbm [shape: bf16[128,128], index: 3, kind: input, shape index: {}]   ;;  %s2250_s4 = inlined_call_operand.hbm [shape: f32[1,128], index: 4, kind: input, shape index: {}]   ;;  %s2251_s5 = inlined_call_operand.hbm [shape: bf16[128,128], index: 5, kind: input, shape index: {}]   ;;  %s2252_s6 = inlined_call_operand.vmem [shape: f32[1,128], index: 6, kind: input, shape index: {}]   ;;  %s2253_s7 = inlined_call_operand.hbm [shape: bf16[128,256], index: 7, kind: input, shape index: {}]   ;;  %s2254_s8 = inlined_call_operand.vmem [shape: f32[1,256], index: 8, kind: input, shape index: {}]   ;;  %s2255_s9 = inlined_call_operand.hbm [shape: f32[256,256], index: 9, kind: output, shape index: {}]  }
   0x1   :  { %2256 = sst [smem:[#allocation19_spill]] %s2247_s1 }
   0x2   :  { %2257 = sst [smem:[#allocation20_spill]] %s2249_s3 }
   0x3   :  { %2258 = sst [smem:[#allocation21_spill]] %s2250_s4 }
   0x4   :  { %2259 = sst [smem:[#allocation22_spill]] %s2251_s5 }
   0x5   :  { %14 = vsyncpa [#allocation3], 0 }
   0x6   :  { %16 = vsyncpa [#allocation3 + $0x1], 0 }
   0x7   :  { %17 = vsyncpa [#allocation6], 0 }
   0x8   :  { %18 = vsyncpa [#allocation9], 0 }
   0x9   :  { %19 = vsyncpa [#allocation12], 0 }
   0xa   :  { %20 = vsyncpa [#allocation4], 0 }
   0xb   :  { %22 = vsyncpa [#allocation4 + $0x1], 0  ;;  %s1928_s30 = smov 0   ;;  %s1930_s10 = smov 0  }
   0xc   :  { %s1932_s11 = smov 0   ;;  %s1934_s12 = smov 0  }
   0xd LB: > { %s2260_s1 = sld [smem:[#allocation19_spill]]  ;;  %s1952_s16 = sadd.s32 4294967295, %s1863_s12   ;;  %s1863_s12 = sphi %s1934_s12, %s2274_s12   ;;  %s1859_s11 = sphi %s1932_s11, %s2273_s11   ;;  %s1855_s10 = sphi %s1930_s10, %s2272_s10   ;;  %s1851_s30 = sphi %s1928_s30, %s2271_s30  }
   0xe   : > { %p1212_p0 = scmp.ge.s32.totalorder %s1863_s12, 1  ;;  %p49_p1 = scmp.eq.s32.totalorder %s1952_s16, 0 }
   0xf   : > { %p253_p2 = scmp.lt.s32.totalorder %s1863_s12, 5  ;;  %s1865_s18 = smov [#allocation5]  }
  0x10   : > { %s266_s19 = sshll.u32 %s1865_s18, 4  ;;  %s2262_s4 = sld [smem:[#allocation21_spill]]  ;;  %s267_s19 = int_to_ptr.vmem [resolvable:$true] %s266_s19 }
  0x11   : > { %p1957_p3 = pnand %p1212_p0, %p253_p2  ;;  %s2264_s3 = sld [smem:[#allocation20_spill]] }
  0x12   : > { %s1866_s27 = smov [#allocation8]   ;;  %s1867_s29 = smov 64  }
  0x13   : > { %s264_s15 = sshll.u32 %s2260_s1, 4  ;;  %p1521_p4 = pneg %p1957_p3  ;;  %s265_s15 = int_to_ptr.hbm [resolvable:$true] %s264_s15 }
  0x14   : > { %s298_s28 = sshll.u32 %s1866_s27, 4  ;;  %s1868_s13 = smov 4   ;;  %s299_s28 = int_to_ptr.vmem [resolvable:$true] %s298_s28 }
  0x15   : > { %p1968_p5 = pnand %p1521_p4, %p49_p1  ;;  %s2265_s5 = sld [smem:[#allocation22_spill]] }
  0x16   : > { %s296_s22 = sshll.u32 %s2262_s4, 4  ;;  %s1869_s21 = smov [#allocation7]   ;;  %s297_s22 = int_to_ptr.hbm [resolvable:$true] %s296_s22 }
  0x17   : > { %s281_s26 = sshll.u32 %s2264_s3, 4  ;;  %s283_s1 = sshll.u32 %s1869_s21, 4  ;;  %s282_s26 = int_to_ptr.hbm [resolvable:$true] %s281_s26  ;;  %s284_s1 = int_to_ptr.vmem [resolvable:$true] %s283_s1 }
  0x18   : > { %1524 = dma.hbm_to_vmem [thread:$0]  (!%p1968_p5), %s265_s15, 2048, %s267_s19, [#allocation6], %s1867_s29, %s1867_s29, %s1868_s13  }
  0x19   : > { %1530 = dma.hbm_to_vmem [thread:$0]  (!%p1968_p5), %s297_s22, 16, %s299_s28, [#allocation9]  }
  0x1a   : > { %1527 = dma.hbm_to_vmem [thread:$0]  (!%p1968_p5), %s282_s26, 1024, %s284_s1, [#allocation6], %s1867_s29, %s1867_s29, %s1868_s13  }
  0x1b   : > { %s307_s20 = sshll.u32 %s2265_s5, 4  ;;  %s1870_s15 = smov [#allocation10]   ;;  %s308_s20 = int_to_ptr.hbm [resolvable:$true] %s307_s20 }
  0x1c   : > { %s309_s19 = sshll.u32 %s1870_s15, 4  ;;  %s324_s25 = sshll.u32 %s2253_s7, 4  ;;  %s310_s19 = int_to_ptr.vmem [resolvable:$true] %s309_s19  ;;  %s325_s25 = int_to_ptr.hbm [resolvable:$true] %s324_s25 }
  0x1d   : > { %1533 = dma.hbm_to_vmem [thread:$0]  (!%p1968_p5), %s308_s20, 1024, %s310_s19, [#allocation9], %s1867_s29, %s1867_s29, %s1868_s13  }
  0x1e   : > { %s1871_s27 = smov [#allocation11]   ;;  %s1872_s26 = smov 128  }
  0x1f   : > { %s326_s1 = sshll.u32 %s1871_s27, 4  ;;  %s1873_s28 = smov 8   ;;  %s327_s1 = int_to_ptr.vmem [resolvable:$true] %s326_s1 }
  0x20   : > { %1536 = dma.hbm_to_vmem [thread:$0]  (!%p1968_p5), %s325_s25, 2048, %s327_s1, [#allocation12], %s1872_s26, %s1872_s26, %s1873_s28  }
  0x21   : > { %s1211_s14 = sadd.s32 4294967294, %s1863_s12   ;;  %s1993_s18 = sadd.s32 1, %s1863_s12  }
  0x22   : > { %s35_s21 = sadd.s32 1, %s1859_s11  ;;  %s32_s15 = ssub.s32 %s1863_s12, %s1993_s18 }
  0x23   : > { %p42_p6 = scmp.ne.s32.totalorder %s1859_s11, %s1855_s10  ;;  %p33_p7 = scmp.eq.s32.totalorder %s32_s15, 0 }
  0x24   : > { %p43_p8 = scmp.eq.s32.totalorder %s1863_s12, 0  ;;  %p48_p9 = scmp.ne.s32.totalorder %s1855_s10, %s1851_s30 }
  0x25   : > { %p240_p10 = scmp.eq.s32.totalorder %s1952_s16, 3  ;;  %p246_p0 = scmp.eq.s32.totalorder %s1211_s14, 3 }
  0x26   : > { %s2005_s29 = scalar_select %p33_p7, %s1859_s11, %s35_s21  }
  0x27   : > { %p2007_p11 = por %p43_p8, %p42_p6  ;;  %p2013_p12 = por %p49_p1, %p48_p9 }
  0x28   : > { %p2017_p13 = por %p240_p10, %p42_p6  ;;  %p1550_p2 = scmp.lt.s32.totalorder %s1863_s12, 4 }
  0x29   : > { %s343_s19 = sand.u32 1, %s1859_s11   ;;  %p2023_p4 = por %p246_p0, %p48_p9 }
  0x2a   : > { %s1219_s24 = sshll.u32 %s343_s19, 7  ;;  %s1430_s25 = sshll.u32 %s1863_s12, 7 }
  0x2b   : > { %s353_s26 = scalar_lea.hbm %s2246_s0, %s1430_s25  ;;  %s347_s21 = scalar_lea.vmem [#allocation2], %s1219_s24 }
  0x2c   : > { %s354_s28 = sshll.u32 %s353_s26, 4  ;;  %s356_s15 = sshll.u32 %s347_s21, 4  ;;  %s355_s28 = int_to_ptr.hbm [resolvable:$true] %s354_s28  ;;  %s357_s15 = int_to_ptr.vmem [resolvable:$true] %s356_s15 }
  0x2d   : > { %p2033_p5 = pnand %p1550_p2, %p2007_p11  ;;  %s344_s3 = scalar_lea.sflag [#allocation3], %s343_s19 }
  0x2e   : > { %s1755_s4 = sshra.s32 %s355_s28, 4  ;;  %s1762_s27 = scalar_lea.hbm %s2246_s0, 512  ;;  %s1756_s4 = int_to_ptr.hbm [resolvable:$true] %s1755_s4 }
  0x2f   : > { %s1757_s5 = scalar_lea.hbm %s1756_s4, 128  ;;  %p1759_p7 = pneg %p2033_p5 }
  0x30   : > { %p1758_p6 = scmp.ne.s32.totalorder %s1756_s4, %s1757_s5  ;;  %p1763_p10 = scmp.lt.s32.totalorder %s1756_s4, %s2246_s0 }
  0x31   : > { %p1764_p11 = scmp.lt.s32.totalorder %s1762_s27, %s1757_s5 }
  0x32   : > { %p1760_p8 = pnand %p1759_p7, %p1758_p6 }
  0x33   : > { %p1765_p0 = por %p1764_p11, %p1763_p10 }
  0x34   : > { %p1761_p9 = pneg %p1760_p8 }
  0x36   : > { %p1766_p2 = pnand %p1765_p0, %p1761_p9 }
  0x38   : > { %1769 = shalt.err (!%p1766_p2)
}
  0x39   : > { %s1874_s19 = smov 256   ;;  %s1875_s26 = smov 16  }
  0x3a   : > { %1540 = dma.hbm_to_vmem [thread:$0]  (!%p2033_p5), %s355_s28, 2048, %s357_s15, %s344_s3, %s1874_s19, %s1874_s19, %s1875_s26  }
  0x3b   : > { %368 = sbr.rel (%p1957_p3) target bundleno = 728 (0x2d8), region = 56  ;;  %s2050_s21 = sand.u32 (!%p1957_p3), 1, %s1855_s10  }
  0x3c   : > { %s1224_s4 = sshll.u32 (!%p1957_p3), %s2050_s21, 7  ;;  %s371_s5 = scalar_lea.sflag (!%p1957_p3), [#allocation3], %s2050_s21 }
  0x3d   : > { %s2056_s25 = scalar_lea.vmem (!%p1957_p3), [#allocation2], %s1224_s4 }
  0x40   : > { %1830 = dma.done.wait (%p2013_p12), %s371_s5, 2048  }
  0x41   : > { %1832 = vsyncadd (%p2013_p12), %s371_s5, 4294965248 }
  0x42   : > { %1834 = dma.done.wait (%p49_p1), [#allocation6], 3072  }
  0x43   : > { %1836 = vsyncadd (%p49_p1), [#allocation6], 4294964224 }
  0x44   : > { %1838 = dma.done.wait (%p49_p1), [#allocation9], 1040  }
  0x45   : > { %1840 = vsyncadd (%p49_p1), [#allocation9], 4294966256 }
  0x46   : > { %1842 = dma.done.wait (%p49_p1), [#allocation12], 2048  }
  0x47   : > { %1844 = vsyncadd (%p49_p1), [#allocation12], 4294965248  ;;  %v1438_v0 = vld [vmem:[#allocation5 + $0x38] sm:$0xff]  ;;  %v1437_v2 = vld [vmem:[#allocation5 + $0x30] sm:$0xff]  ;;  %s2167_s24 = scalar_lea.vmem [#allocation13], %s1224_s4  ;;  %s1480_s27 = sshll.u32 %s1952_s16, 7 }
  0x48   : > { %v1446_v1 = vld [vmem:[#allocation5 + $0x78] sm:$0xff]  ;;  %593 = vmatpush.bf16.msra.mxu0 %v1438_v0  ;;  %v1445_v3 = vld [vmem:[#allocation5 + $0x70] sm:$0xff]  ;;  %1481 = vmatpush.bf16.msra.mxu2 %v1438_v0  ;;  %v1436_v4 = vld [vmem:[#allocation5 + $0x28] sm:$0xff]  ;;  %s1086_s19 = scalar_lea.hbm %s2255_s9, %s1480_s27  ;;  %s1087_s26 = sshll.u32 %s2167_s24, 4  ;;  %s1088_s26 = int_to_ptr.vmem [resolvable:$true] %s1087_s26 }
  0x49   : > { %622 = vmatpush.bf16.msra.mxu1 %v1446_v1  ;;  %1489 = vmatpush.bf16.msra.mxu3 %v1446_v1  ;;  %v1444_v5 = vld [vmem:[#allocation5 + $0x68] sm:$0xff]  ;;  %v1435_v6 = vld [vmem:[#allocation5 + $0x20] sm:$0xff]  ;;  %v1434_v8 = vld [vmem:[#allocation5 + $0x18] sm:$0xff]  ;;  %s1089_s4 = sshll.u32 %s1086_s19, 4  ;;  %s1074_s16 = scalar_lea.sflag [#allocation4], %s2050_s21  ;;  %s1090_s4 = int_to_ptr.hbm [resolvable:$true] %s1089_s4 }
  0x4a   : > { %v1443_v7 = vld [vmem:[#allocation5 + $0x60] sm:$0xff]  ;;  %v1442_v9 = vld [vmem:[#allocation5 + $0x58] sm:$0xff]  ;;  %v1433_v10 = vld [vmem:[#allocation5 + $0x10] sm:$0xff]  ;;  %s1799_s5 = sshra.s32 %s1090_s4, 4  ;;  %s1805_s23 = scalar_lea.hbm %s2255_s9, 512  ;;  %s1800_s5 = int_to_ptr.hbm [resolvable:$true] %s1799_s5 }
  0x4b   : > { %v1441_v11 = vld [vmem:[#allocation5 + $0x50] sm:$0xff]  ;;  %v1432_v12 = vld [vmem:[#allocation5 + $0x8] sm:$0xff]  ;;  %v1431_v14 = vld [vmem:[#allocation5] sm:$0xff]  ;;  %p1806_p5 = scmp.lt.s32.totalorder %s1800_s5, %s2255_s9 }
  0x4c   : > { %594 = vmatpush.bf16.msra.mxu0 %v1437_v2  ;;  %1482 = vmatpush.bf16.msra.mxu2 %v1437_v2  ;;  %v1440_v13 = vld [vmem:[#allocation5 + $0x48] sm:$0xff]  ;;  %v1439_v15 = vld [vmem:[#allocation5 + $0x40] sm:$0xff]  ;;  %v2078_v17 = vld [vmem:[%s2056_s25 + $0x10] sm:$0xff] }
  0x4d   : > { %623 = vmatpush.bf16.msra.mxu1 %v1445_v3  ;;  %1490 = vmatpush.bf16.msra.mxu3 %v1445_v3  ;;  %v2075_v16 = vld [vmem:[%s2056_s25] sm:$0xff]  ;;  %v2081_v18 = vld [vmem:[%s2056_s25 + $0x8] sm:$0xff]  ;;  %v2084_v19 = vld [vmem:[%s2056_s25 + $0x18] sm:$0xff] }
  0x4e   : > { %v2087_v20 = vld [vmem:[%s2056_s25 + $0x40] sm:$0xff]  ;;  %v2090_v21 = vld [vmem:[%s2056_s25 + $0x50] sm:$0xff]  ;;  %v2093_v22 = vld [vmem:[%s2056_s25 + $0x48] sm:$0xff]  ;;  %v453_v25 = vpack.c.bf16 %v2078_v17, %v2075_v16  ;;  %v454_v26 = vpack.c.bf16 %v2084_v19, %v2081_v18 }
  0x4f   : > { %v2096_v23 = vld [vmem:[%s2056_s25 + $0x58] sm:$0xff]  ;;  %v457_v27 = vpack.c.bf16 %v2090_v21, %v2087_v20  ;;  %v1453_v29 = vld [vmem:[#allocation7 + $0x30] sm:$0xff]  ;;  %v1452_v30 = vld [vmem:[#allocation7 + $0x28] sm:$0xff] }
  0x50   : > { %595 = vmatpush.bf16.msra.mxu0 %v1436_v4  ;;  %1483 = vmatpush.bf16.msra.mxu2 %v1436_v4  ;;  %v1454_v24 = vld [vmem:[#allocation7 + $0x38] sm:$0xff]  ;;  %v458_v28 = vpack.c.bf16 %v2096_v23, %v2093_v22  ;;  %v1451_v31 = vld [vmem:[#allocation7 + $0x20] sm:$0xff]  ;;  %v2110_v33 = vld [vmem:[%s2056_s25 + $0x30] sm:$0xff] }
  0x51   : > { %624 = vmatpush.bf16.msra.mxu1 %v1444_v5  ;;  %1491 = vmatpush.bf16.msra.mxu3 %v1444_v5  ;;  %v2107_v32 = vld [vmem:[%s2056_s25 + $0x20] sm:$0xff]  ;;  %v2113_v34 = vld [vmem:[%s2056_s25 + $0x28] sm:$0xff]  ;;  %v2116_v35 = vld [vmem:[%s2056_s25 + $0x38] sm:$0xff] }
  0x52   : > { %v2119_v36 = vld [vmem:[%s2056_s25 + $0x60] sm:$0xff]  ;;  %v2122_v37 = vld [vmem:[%s2056_s25 + $0x70] sm:$0xff]  ;;  %v2125_v38 = vld [vmem:[%s2056_s25 + $0x68] sm:$0xff]  ;;  %v455_v40 = vpack.c.bf16 %v2110_v33, %v2107_v32  ;;  %v456_v41 = vpack.c.bf16 %v2116_v35, %v2113_v34 }
  0x53   : > { %v2128_v39 = vld [vmem:[%s2056_s25 + $0x78] sm:$0xff]  ;;  %v459_v42 = vpack.c.bf16 %v2122_v37, %v2119_v36  ;;  %v1449_v45 = vld [vmem:[#allocation7 + $0x10] sm:$0xff]  ;;  %v1448_v46 = vld [vmem:[#allocation7 + $0x8] sm:$0xff]  ;;  %s1801_s25 = scalar_lea.hbm %s1800_s5, 128 }
  0x54   : > { %596 = vmatpush.bf16.msra.mxu0 %v1435_v6  ;;  %1484 = vmatpush.bf16.msra.mxu2 %v1435_v6  ;;  %v460_v43 = vpack.c.bf16 %v2128_v39, %v2125_v38  ;;  %v1450_v44 = vld [vmem:[#allocation7 + $0x18] sm:$0xff]  ;;  %v1447_v47 = vld [vmem:[#allocation7] sm:$0xff]  ;;  %p1802_p1 = scmp.ne.s32.totalorder %s1800_s5, %s1801_s25  ;;  %p1807_p6 = scmp.lt.s32.totalorder %s1805_s23, %s1801_s25 }
  0x55   : > { %625 = vmatpush.bf16.msra.mxu1 %v1443_v7  ;;  %1492 = vmatpush.bf16.msra.mxu3 %v1443_v7  ;;  %v1602_v50 = vld [vmem:[%s2248_s2] ss:$0 sm:$0xff] }
  0x56   : > { %p1803_p3 = pnand %p1802_p1, %p2017_p13  ;;  %p1808_p7 = por %p1807_p6, %p1806_p5 }
  0x58   : > { %597 = vmatpush.bf16.msra.mxu0 %v1434_v8  ;;  %1485 = vmatpush.bf16.msra.mxu2 %v1434_v8  ;;  %p1804_p12 = pneg %p1803_p3 }
  0x59   : > { %626 = vmatpush.bf16.msra.mxu1 %v1442_v9  ;;  %1493 = vmatpush.bf16.msra.mxu3 %v1442_v9 }
  0x5a   : > { %p1809_p8 = pnand %p1808_p7, %p1804_p12 }
  0x5c   : > { %598 = vmatpush.bf16.msra.mxu0 %v1433_v10  ;;  %1486 = vmatpush.bf16.msra.mxu2 %v1433_v10 }
  0x5d   : > { %627 = vmatpush.bf16.msra.mxu1 %v1441_v11  ;;  %1494 = vmatpush.bf16.msra.mxu3 %v1441_v11  ;;  %v1462_v11 = vld [vmem:[#allocation10 + $0x38] sm:$0xff] }
  0x60   : > { %599 = vmatpush.bf16.msra.mxu0 %v1432_v12  ;;  %1487 = vmatpush.bf16.msra.mxu2 %v1432_v12 }
  0x61   : > { %628 = vmatpush.bf16.msra.mxu1 %v1440_v13  ;;  %1495 = vmatpush.bf16.msra.mxu3 %v1440_v13 }
  0x64   : > { %600 = vmatpush.bf16.msra.mxu0 %v1431_v14  ;;  %1488 = vmatpush.bf16.msra.mxu2 %v1431_v14  ;;  %v1461_v14 = vld [vmem:[#allocation10 + $0x30] sm:$0xff] }
  0x65   : > { %629 = vmatpush.bf16.msra.mxu1 %v1439_v15  ;;  %1496 = vmatpush.bf16.msra.mxu3 %v1439_v15 }
  0x67   : > { %601 = vmatmul.bf16.vlgmr.msra.gmra.mxu0 %v453_v25  ;;  %611 = vmatmul.bf16.vlgmr.msra.gmra.mxu2 %v457_v27 }
  0x68   : > { %731 = vmatpush.bf16.msrb.mxu2 %v1454_v24  ;;  %630 = vmatmul.bf16.vlgmr.msra.gmra.mxu1 %v454_v26  ;;  %v1460_v26 = vld [vmem:[#allocation10 + $0x28] sm:$0xff] }
  0x69   : > { %640 = vmatmul.bf16.vlgmr.msra.gmra.mxu3 %v458_v28 }
  0x6a   : > { %840 = vmatpush.bf16.msrb.mxu3 %v1462_v11  ;;  %v1476_v11 = vld [vmem:[#allocation11 + $0x64] sm:$0xf0] }
  0x6c   : > { %732 = vmatpush.bf16.msrb.mxu2 %v1453_v29 }
  0x6e   : > { %841 = vmatpush.bf16.msrb.mxu3 %v1461_v14  ;;  %v1411_v14 = vld [vmem:[#allocation11 + $0x68] sm:$0xf0] }
  0x70   : > { %733 = vmatpush.bf16.msrb.mxu2 %v1452_v30  ;;  %v1459_v30 = vld [vmem:[#allocation10 + $0x20] sm:$0xff] }
  0x72   : > { %842 = vmatpush.bf16.msrb.mxu3 %v1460_v26  ;;  %v1474_v26 = vld [vmem:[#allocation11 + $0x54] sm:$0xf0] }
  0x74   : > { %734 = vmatpush.bf16.msrb.mxu2 %v1451_v31 }
  0x76   : > { %843 = vmatpush.bf16.msrb.mxu3 %v1459_v30 }
  0x77   : > { %606 = vmatmul.bf16.gmra.mxu0 %v455_v40  ;;  %616 = vmatmul.bf16.gmra.mxu2 %v459_v42  ;;  %v1458_v40 = vld [vmem:[#allocation10 + $0x18] sm:$0xff] }
  0x78   : > { %635 = vmatmul.bf16.gmra.mxu1 %v456_v41  ;;  %735 = vmatpush.bf16.msrb.mxu2 %v1450_v44 }
  0x79   : > { %645 = vmatmul.bf16.gmra.mxu3 %v460_v43 }
  0x7a   : > { %844 = vmatpush.bf16.msrb.mxu3 %v1458_v40  ;;  %v1393_v40 = vld [vmem:[#allocation11 + $0x40] sm:$0xf] }
  0x7c   : > { %736 = vmatpush.bf16.msrb.mxu2 %v1449_v45 }
  0x80   : > { %737 = vmatpush.bf16.msrb.mxu2 %v1448_v46 }
  0x84   : > { %738 = vmatpush.bf16.msrb.mxu2 %v1447_v47 }
  0xe4   : > { %v602_v48 = vpop.f32.mrf.mxu0 }
  0xe5   : > { %v631_v49 = vpop.f32.mrf.mxu1  ;;  %v603_v51 = vadd.f32 %v1602_v50, %v602_v48 }
  0xe7   : > { %v632_v54 = vadd.f32 %v631_v49, %v603_v51  ;;  %v1457_v51 = vld [vmem:[#allocation10 + $0x10] sm:$0xff] }
  0xe8   : > { %845 = vmatpush.bf16.msrb.mxu3 %v1457_v51  ;;  %v1385_v51 = vld [vmem:[#allocation11 + $0x30] sm:$0xf] }
  0xe9   : > { %v651_v57 = vmax.f32 %v632_v54, 0.0 }
  0xea   : > { %v612_v62 = vpop.f32.mrf.mxu2 }
  0xeb   : > { %v613_v12 = vadd.f32 %v1602_v50, %v612_v62 }
  0xec   : > { %v604_v52 = vpop.f32.mrf.mxu0  ;;  %v641_v0 = vpop.f32.mrf.mxu3 }
  0xed   : > { %v633_v53 = vpop.f32.mrf.mxu1  ;;  %v605_v55 = vadd.f32 %v1602_v50, %v604_v52  ;;  %v642_v24 = vadd.f32 %v641_v0, %v613_v12  ;;  %v1456_v52 = vld [vmem:[#allocation10 + $0x8] sm:$0xff] }
  0xee   : > { %846 = vmatpush.bf16.msrb.mxu3 %v1456_v52  ;;  %v1470_v52 = vld [vmem:[#allocation11 + $0x34] sm:$0xf0] }
  0xef   : > { %v634_v56 = vadd.f32 %v633_v53, %v605_v55  ;;  %v655_v28 = vmax.f32 %v642_v24, 0.0  ;;  %v1455_v53 = vld [vmem:[#allocation10] sm:$0xff]  ;;  %v2141_v55 = vld [vmem:[#allocation8] ss:$0 sm:$0xff] }
  0xf1   : > { %v652_v58 = vmax.f32 %v634_v56, 0.0 }
  0xf2   : > { %v614_v6 = vpop.f32.mrf.mxu2  ;;  %847 = vmatpush.bf16.msrb.mxu3 %v1455_v53  ;;  %v1469_v53 = vld [vmem:[#allocation11 + $0x34] sm:$0xf] }
  0xf3   : > { %v659_v59 = vpack.c.bf16 %v652_v58, %v651_v57  ;;  %v615_v13 = vadd.f32 %v1602_v50, %v614_v6  ;;  %v1477_v6 = vld [vmem:[#allocation11 + $0x74] sm:$0xf] }
  0xf4   : > { %v607_v60 = vpop.f32.mrf.mxu0  ;;  %v643_v10 = vpop.f32.mrf.mxu3 }
  0xf5   : > { %v636_v61 = vpop.f32.mrf.mxu1  ;;  %739 = vmatmul.bf16.vlgmr.msrb.gmra.mxu2 %v659_v59  ;;  %v608_v63 = vadd.f32 %v1602_v50, %v607_v60  ;;  %v644_v25 = vadd.f32 %v643_v10, %v615_v13  ;;  %v1409_v10 = vld [vmem:[#allocation11 + $0x60] sm:$0xf]  ;;  %v1475_v13 = vld [vmem:[#allocation11 + $0x64] sm:$0xf] }
  0xf6   : > { %v1414_v24 = vor.u32 %v1475_v13, %v1411_v14  ;;  %v1464_v13 = vld [vmem:[#allocation11 + $0x4] sm:$0xf0]  ;;  %v1463_v14 = vld [vmem:[#allocation11 + $0x4] sm:$0xf] }
  0xf7   : > { %v637_v2 = vadd.f32 %v636_v61, %v608_v63  ;;  %v656_v29 = vmax.f32 %v644_v25, 0.0  ;;  %v1401_v25 = vld [vmem:[#allocation11 + $0x50] sm:$0xf] }
  0xf9   : > { %v653_v7 = vmax.f32 %v637_v2, 0.0  ;;  %v661_v31 = vpack.c.bf16 %v656_v29, %v655_v28  ;;  %v1403_v28 = vld [vmem:[#allocation11 + $0x58] sm:$0xf0]  ;;  %v1402_v29 = vor.u32 %v1474_v26, %v1401_v25 }
  0xfa   : > { %v617_v15 = vpop.f32.mrf.mxu2 }
  0xfb   : > { %v618_v42 = vadd.f32 %v1602_v50, %v617_v15  ;;  %v1410_v15 = vor.u32 %v1476_v11, %v1409_v10  ;;  %v1371_v11 = vld [vmem:[#allocation11 + $0x18] sm:$0xf0] }
  0xfc   : > { %v609_v1 = vpop.f32.mrf.mxu0  ;;  %v646_v27 = vpop.f32.mrf.mxu3 }
  0xfd   : > { %v610_v3 = vadd.f32 %v1602_v50, %v609_v1  ;;  %v638_v4 = vpop.f32.mrf.mxu1  ;;  %v647_v45 = vadd.f32 %v646_v27, %v618_v42  ;;  %v1473_v27 = vld [vmem:[#allocation11 + $0x54] sm:$0xf] }
  0xff   : > { %v639_v5 = vadd.f32 %v638_v4, %v610_v3  ;;  %v657_v47 = vmax.f32 %v647_v45, 0.0  ;;  %v1417_v4 = vld [vmem:[#allocation11 + $0x70] sm:$0xf] }
 0x101   : > { %v654_v8 = vmax.f32 %v639_v5, 0.0  ;;  %v1478_v5 = vld [vmem:[#allocation11 + $0x74] sm:$0xf0] }
 0x102   : > { %v619_v41 = vpop.f32.mrf.mxu2 }
 0x103   : > { %v660_v9 = vpack.c.bf16 %v654_v8, %v653_v7  ;;  %v620_v43 = vadd.f32 %v1602_v50, %v619_v41  ;;  %v1418_v8 = vor.u32 %v1478_v5, %v1417_v4  ;;  %v1472_v41 = vld [vmem:[#allocation11 + $0x44] sm:$0xf0]  ;;  %v1379_v5 = vld [vmem:[#allocation11 + $0x28] sm:$0xf0] }
 0x104   : > { %v648_v44 = vpop.f32.mrf.mxu3 }
 0x105   : > { %744 = vmatmul.bf16.gmra.mxu2 %v660_v9  ;;  %v649_v46 = vadd.f32 %v648_v44, %v620_v43  ;;  %v1419_v9 = vld [vmem:[#allocation11 + $0x78] sm:$0xf0]  ;;  %983 = vmatpush.bf16.msrb.mxu0 %v1418_v8  ;;  %v1471_v43 = vld [vmem:[#allocation11 + $0x44] sm:$0xf]  ;;  %v1395_v44 = vld [vmem:[#allocation11 + $0x48] sm:$0xf0] }
 0x106   : > { %v1422_v12 = vor.u32 %v1477_v6, %v1419_v9  ;;  %v1466_v8 = vld [vmem:[#allocation11 + $0x14] sm:$0xf0]  ;;  %v1465_v9 = vld [vmem:[#allocation11 + $0x14] sm:$0xf] }
 0x107   : > { %v658_v48 = vmax.f32 %v649_v46, 0.0  ;;  %v1394_v46 = vor.u32 %v1472_v41, %v1393_v40 }
 0x108   : > { %1012 = vmatpush.bf16.msrb.mxu1 %v1422_v12  ;;  %v1374_v12 = vor.u32 %v1465_v9, %v1371_v11 }
 0x109   : > { %v662_v49 = vpack.c.bf16 %v658_v48, %v657_v47  ;;  %984 = vmatpush.bf16.msrb.mxu0 %v1410_v15 }
 0x10c   : > { %1013 = vmatpush.bf16.msrb.mxu1 %v1414_v24  ;;  %v1363_v24 = vld [vmem:[#allocation11 + $0x8] sm:$0xf0] }
 0x10d   : > { %985 = vmatpush.bf16.msrb.mxu0 %v1402_v29  ;;  %v1366_v25 = vor.u32 %v1463_v14, %v1363_v24 }
 0x111   : > { %986 = vmatpush.bf16.msrb.mxu0 %v1394_v46 }
 0x115   : > { %749 = vmatmul.bf16.gmra.mxu2 %v661_v31  ;;  %v1406_v31 = vor.u32 %v1473_v27, %v1403_v28  ;;  %v1604_v27 = vld [vmem:[%s2252_s6] ss:$0 sm:$0xff] }
 0x117   : > { %1014 = vmatpush.bf16.msrb.mxu1 %v1406_v31 }
 0x125   : > { %754 = vmatmul.bf16.gmra.mxu2 %v662_v49  ;;  %v1398_v49 = vor.u32 %v1471_v43, %v1395_v44 }
 0x127   : > { %1015 = vmatpush.bf16.msrb.mxu1 %v1398_v49 }
 0x178   : > { %v740_v54 = vpop.f32.mrf.mxu2 }
 0x179   : > { %v741_v56 = vadd.f32 %v2141_v55, %v740_v54  ;;  %v1387_v54 = vld [vmem:[#allocation11 + $0x38] sm:$0xf0] }
 0x17b   : > { %v760_v58 = vmax.f32 %v741_v56, 0.0 }
 0x180   : > { %v742_v50 = vpop.f32.mrf.mxu2 }
 0x181   : > { %v743_v57 = vadd.f32 %v2141_v55, %v742_v50  ;;  %v1386_v50 = vor.u32 %v1470_v52, %v1385_v51 }
 0x183   : > { %v761_v59 = vmax.f32 %v743_v57, 0.0  ;;  %v1390_v57 = vor.u32 %v1469_v53, %v1387_v54  ;;  %987 = vmatpush.bf16.msrb.mxu0 %v1386_v50 }
 0x185   : > { %v768_v60 = vpack.c.bf16 %v761_v59, %v760_v58  ;;  %1016 = vmatpush.bf16.msrb.mxu1 %v1390_v57 }
 0x187   : > { %848 = vmatmul.bf16.vlgmr.msrb.gmra.mxu3 %v768_v60 }
 0x188   : > { %v745_v61 = vpop.f32.mrf.mxu2 }
 0x189   : > { %v746_v62 = vadd.f32 %v2141_v55, %v745_v61 }
 0x18b   : > { %v762_v1 = vmax.f32 %v746_v62, 0.0 }
 0x190   : > { %v747_v63 = vpop.f32.mrf.mxu2 }
 0x191   : > { %v748_v0 = vadd.f32 %v2141_v55, %v747_v63 }
 0x193   : > { %v763_v2 = vmax.f32 %v748_v0, 0.0 }
 0x195   : > { %v769_v3 = vpack.c.bf16 %v763_v2, %v762_v1  ;;  %v1377_v1 = vld [vmem:[#allocation11 + $0x20] sm:$0xf]  ;;  %v1468_v2 = vld [vmem:[#allocation11 + $0x24] sm:$0xf0] }
 0x196   : > { %v1378_v4 = vor.u32 %v1468_v2, %v1377_v1 }
 0x197   : > { %853 = vmatmul.bf16.gmra.mxu3 %v769_v3  ;;  %v1467_v3 = vld [vmem:[#allocation11 + $0x24] sm:$0xf] }
 0x198   : > { %v750_v7 = vpop.f32.mrf.mxu2  ;;  %v1382_v6 = vor.u32 %v1467_v3, %v1379_v5  ;;  %988 = vmatpush.bf16.msrb.mxu0 %v1378_v4 }
 0x199   : > { %v751_v30 = vadd.f32 %v2141_v55, %v750_v7  ;;  %v1369_v7 = vld [vmem:[#allocation11 + $0x10] sm:$0xf] }
 0x19a   : > { %v1370_v10 = vor.u32 %v1466_v8, %v1369_v7  ;;  %1017 = vmatpush.bf16.msrb.mxu1 %v1382_v6 }
 0x19b   : > { %v764_v47 = vmax.f32 %v751_v30, 0.0 }
 0x19c   : > { %989 = vmatpush.bf16.msrb.mxu0 %v1370_v10 }
 0x19e   : > { %1018 = vmatpush.bf16.msrb.mxu1 %v1374_v12 }
 0x1a0   : > { %v752_v42 = vpop.f32.mrf.mxu2 }
 0x1a1   : > { %v753_v45 = vadd.f32 %v2141_v55, %v752_v42 }
 0x1a2   : > { %1019 = vmatpush.bf16.msrb.mxu1 %v1366_v25 }
 0x1a3   : > { %v765_v48 = vmax.f32 %v753_v45, 0.0 }
 0x1a5   : > { %v770_v56 = vpack.c.bf16 %v765_v48, %v764_v47 }
 0x1a7   : > { %858 = vmatmul.bf16.gmra.mxu3 %v770_v56 }
 0x1a8   : > { %v755_v58 = vpop.f32.mrf.mxu2 }
 0x1a9   : > { %v756_v59 = vadd.f32 %v2141_v55, %v755_v58 }
 0x1ab   : > { %v766_v62 = vmax.f32 %v756_v59, 0.0 }
 0x1b0   : > { %v757_v60 = vpop.f32.mrf.mxu2 }
 0x1b1   : > { %v758_v61 = vadd.f32 %v2141_v55, %v757_v60  ;;  %v1361_v55 = vld [vmem:[#allocation11] sm:$0xf] }
 0x1b2   : > { %v1362_v15 = vor.u32 %v1464_v13, %v1361_v55 }
 0x1b3   : > { %v767_v63 = vmax.f32 %v758_v61, 0.0 }
 0x1b4   : > { %990 = vmatpush.bf16.msrb.mxu0 %v1362_v15 }
 0x1b5   : > { %v771_v0 = vpack.c.bf16 %v767_v63, %v766_v62 }
 0x1b7   : > { %863 = vmatmul.bf16.gmra.mxu3 %v771_v0  ;;  %v897_v0 = vld [vmem:[%s2254_s8] sm:$0x3] }
 0x1b8   : > { %v2157_v1 = vperm.slane %v897_v0, 0  ;;  %v2159_v2 = vperm.slane %v897_v0, 1 }
 0x20a   : > { %v849_v26 = vpop.f32.mrf.mxu3 }
 0x20b   : > { %v850_v28 = vadd.f32 %v1604_v27, %v849_v26 }
 0x20d   : > { %v869_v31 = vmax.f32 %v850_v28, 0.0 }
 0x212   : > { %v851_v29 = vpop.f32.mrf.mxu3 }
 0x213   : > { %v852_v30 = vadd.f32 %v1604_v27, %v851_v29 }
 0x215   : > { %v870_v40 = vmax.f32 %v852_v30, 0.0 }
 0x217   : > { %v877_v41 = vpack.c.bf16 %v870_v40, %v869_v31 }
 0x219   : > { %991 = vmatmul.bf16.vlgmr.msrb.gmra.mxu0 %v877_v41  ;;  %1020 = vmatmul.bf16.vlgmr.msrb.gmra.mxu1 %v877_v41 }
 0x21a   : > { %v854_v42 = vpop.f32.mrf.mxu3 }
 0x21b   : > { %v855_v43 = vadd.f32 %v1604_v27, %v854_v42 }
 0x21d   : > { %v871_v46 = vmax.f32 %v855_v43, 0.0 }
 0x222   : > { %v856_v44 = vpop.f32.mrf.mxu3 }
 0x223   : > { %v857_v45 = vadd.f32 %v1604_v27, %v856_v44 }
 0x225   : > { %v872_v47 = vmax.f32 %v857_v45, 0.0 }
 0x227   : > { %v878_v48 = vpack.c.bf16 %v872_v47, %v871_v46 }
 0x229   : > { %996 = vmatmul.bf16.gmra.mxu0 %v878_v48  ;;  %1025 = vmatmul.bf16.gmra.mxu1 %v878_v48 }
 0x22a   : > { %v859_v49 = vpop.f32.mrf.mxu3 }
 0x22b   : > { %v860_v51 = vadd.f32 %v1604_v27, %v859_v49 }
 0x22d   : > { %v873_v54 = vmax.f32 %v860_v51, 0.0 }
 0x232   : > { %v861_v52 = vpop.f32.mrf.mxu3 }
 0x233   : > { %v862_v53 = vadd.f32 %v1604_v27, %v861_v52 }
 0x235   : > { %v874_v56 = vmax.f32 %v862_v53, 0.0 }
 0x237   : > { %v879_v50 = vpack.c.bf16 %v874_v56, %v873_v54 }
 0x239   : > { %1001 = vmatmul.bf16.gmra.mxu0 %v879_v50  ;;  %1030 = vmatmul.bf16.gmra.mxu1 %v879_v50 }
 0x23a   : > { %v864_v57 = vpop.f32.mrf.mxu3 }
 0x23b   : > { %v865_v58 = vadd.f32 %v1604_v27, %v864_v57 }
 0x23d   : > { %v875_v61 = vmax.f32 %v865_v58, 0.0 }
 0x242   : > { %v866_v59 = vpop.f32.mrf.mxu3 }
 0x243   : > { %v867_v60 = vadd.f32 %v1604_v27, %v866_v59 }
 0x245   : > { %v876_v62 = vmax.f32 %v867_v60, 0.0 }
 0x247   : > { %v880_v63 = vpack.c.bf16 %v876_v62, %v875_v61 }
 0x249   : > { %1006 = vmatmul.bf16.gmra.mxu0 %v880_v63  ;;  %1035 = vmatmul.bf16.gmra.mxu1 %v880_v63 }
 0x296   : > { %v992_v3 = vpop.f32.mrf.mxu0  ;;  %v1021_v4 = vpop.f32.mrf.mxu1 }
 0x297   : > { %v993_v5 = vadd.f32 %v992_v3, %v2157_v1  ;;  %v1022_v6 = vadd.f32 %v1021_v4, %v2159_v2 }
 0x299   : > { %v1041_v7 = vadd.f32 %v993_v5, %v2075_v16  ;;  %v1042_v8 = vadd.f32 %v1022_v6, %v2081_v18 }
 0x29b   : > { %1057 = vst [vmem:[%s2167_s24] sm:$0xff] %v1041_v7 }
 0x29c   : > { %1058 = vst [vmem:[%s2167_s24 + $0x8] sm:$0xff] %v1042_v8 }
 0x29e   : > { %v994_v9 = vpop.f32.mrf.mxu0  ;;  %v1023_v10 = vpop.f32.mrf.mxu1 }
 0x29f   : > { %v995_v11 = vadd.f32 %v994_v9, %v2157_v1  ;;  %v1024_v12 = vadd.f32 %v1023_v10, %v2159_v2 }
 0x2a1   : > { %v1043_v16 = vadd.f32 %v995_v11, %v2078_v17  ;;  %v1044_v18 = vadd.f32 %v1024_v12, %v2084_v19 }
 0x2a3   : > { %1059 = vst [vmem:[%s2167_s24 + $0x10] sm:$0xff] %v1043_v16 }
 0x2a4   : > { %1060 = vst [vmem:[%s2167_s24 + $0x18] sm:$0xff] %v1044_v18 }
 0x2a6   : > { %v997_v55 = vpop.f32.mrf.mxu0  ;;  %v1026_v13 = vpop.f32.mrf.mxu1 }
 0x2a7   : > { %v998_v14 = vadd.f32 %v997_v55, %v2157_v1  ;;  %v1027_v15 = vadd.f32 %v1026_v13, %v2159_v2 }
 0x2a9   : > { %v1045_v24 = vadd.f32 %v998_v14, %v2107_v32  ;;  %v1046_v25 = vadd.f32 %v1027_v15, %v2113_v34 }
 0x2ab   : > { %1061 = vst [vmem:[%s2167_s24 + $0x20] sm:$0xff] %v1045_v24 }
 0x2ac   : > { %1062 = vst [vmem:[%s2167_s24 + $0x28] sm:$0xff] %v1046_v25 }
 0x2ae   : > { %v999_v17 = vpop.f32.mrf.mxu0  ;;  %v1028_v19 = vpop.f32.mrf.mxu1 }
 0x2af   : > { %v1000_v26 = vadd.f32 %v999_v17, %v2157_v1  ;;  %v1029_v27 = vadd.f32 %v1028_v19, %v2159_v2 }
 0x2b1   : > { %v1047_v28 = vadd.f32 %v1000_v26, %v2110_v33  ;;  %v1048_v29 = vadd.f32 %v1029_v27, %v2116_v35 }
 0x2b3   : > { %1063 = vst [vmem:[%s2167_s24 + $0x30] sm:$0xff] %v1047_v28 }
 0x2b4   : > { %1064 = vst [vmem:[%s2167_s24 + $0x38] sm:$0xff] %v1048_v29 }
 0x2b6   : > { %v1002_v32 = vpop.f32.mrf.mxu0  ;;  %v1031_v34 = vpop.f32.mrf.mxu1 }
 0x2b7   : > { %v1003_v30 = vadd.f32 %v1002_v32, %v2157_v1  ;;  %v1032_v31 = vadd.f32 %v1031_v34, %v2159_v2 }
 0x2b9   : > { %v1049_v40 = vadd.f32 %v1003_v30, %v2087_v20  ;;  %v1050_v41 = vadd.f32 %v1032_v31, %v2093_v22 }
 0x2bb   : > { %1065 = vst [vmem:[%s2167_s24 + $0x40] sm:$0xff] %v1049_v40 }
 0x2bc   : > { %1066 = vst [vmem:[%s2167_s24 + $0x48] sm:$0xff] %v1050_v41 }
 0x2be   : > { %v1004_v33 = vpop.f32.mrf.mxu0  ;;  %v1033_v35 = vpop.f32.mrf.mxu1 }
 0x2bf   : > { %v1005_v42 = vadd.f32 %v1004_v33, %v2157_v1  ;;  %v1034_v43 = vadd.f32 %v1033_v35, %v2159_v2 }
 0x2c1   : > { %v1051_v44 = vadd.f32 %v1005_v42, %v2090_v21  ;;  %v1052_v45 = vadd.f32 %v1034_v43, %v2096_v23 }
 0x2c3   : > { %1067 = vst [vmem:[%s2167_s24 + $0x50] sm:$0xff] %v1051_v44 }
 0x2c4   : > { %1068 = vst [vmem:[%s2167_s24 + $0x58] sm:$0xff] %v1052_v45 }
 0x2c6   : > { %v1007_v20 = vpop.f32.mrf.mxu0  ;;  %v1036_v46 = vpop.f32.mrf.mxu1 }
 0x2c7   : > { %v1008_v22 = vadd.f32 %v1007_v20, %v2157_v1  ;;  %v1037_v47 = vadd.f32 %v1036_v46, %v2159_v2 }
 0x2c9   : > { %v1053_v48 = vadd.f32 %v1008_v22, %v2119_v36  ;;  %v1054_v49 = vadd.f32 %v1037_v47, %v2125_v38 }
 0x2cb   : > { %1069 = vst [vmem:[%s2167_s24 + $0x60] sm:$0xff] %v1053_v48 }
 0x2cc   : > { %1070 = vst [vmem:[%s2167_s24 + $0x68] sm:$0xff] %v1054_v49 }
 0x2ce   : > { %v1009_v21 = vpop.f32.mrf.mxu0  ;;  %v1038_v23 = vpop.f32.mrf.mxu1 }
 0x2cf   : > { %v1010_v51 = vadd.f32 %v1009_v21, %v2157_v1  ;;  %v1039_v52 = vadd.f32 %v1038_v23, %v2159_v2 }
 0x2d1   : > { %v1055_v36 = vadd.f32 %v1010_v51, %v2122_v37  ;;  %v1056_v38 = vadd.f32 %v1039_v52, %v2128_v39 }
 0x2d3   : > { %1071 = vst [vmem:[%s2167_s24 + $0x70] sm:$0xff] %v1055_v36 }
 0x2d4   : > { %1072 = vst [vmem:[%s2167_s24 + $0x78] sm:$0xff] %v1056_v38 }
 0x2d5   : > { %1812 = shalt.err (!%p1809_p8)
}
 0x2d6   : > { %s1876_s21 = smov 256   ;;  %s1877_s14 = smov 16  }
 0x2d7   : > { %1519 = dma.vmem_to_hbm [thread:$0]  (%p2017_p13), %s1088_s26, 2048, %s1090_s4, %s1074_s16, %s1876_s21, %s1876_s21, %s1877_s14  }
 0x2d8 PF: > { %p1556_p9 = scmp.ge.s32.totalorder %s1863_s12, 2  ;;  %s1104_s24 = sand.u32 1, %s1851_s30  }
 0x2d9   : > { %s1105_s27 = scalar_lea.sflag [#allocation4], %s1104_s24 }
 0x2da   : > { %p1542_p10 = pnand %p1556_p9, %p2023_p4 }
 0x2dc   : > { %p1543_p11 = pneg %p1542_p10 }
 0x2de   : > { %1846 = dma.done.wait (%p1543_p11), %s1105_s27, 2048  }
 0x2df   : > { %1848 = vsyncadd (%p1543_p11), %s1105_s27, 4294965248  ;;  %p25_p0 = scmp.ge.s32.totalorder %s1993_s18, 6   ;;  %s2271_s30 = smov %s1855_s10 }
 0x2e0   : > { %s2272_s10 = smov %s1859_s11  ;;  %s2273_s11 = smov %s2005_s29 }
 0x2e1   : > { %s2274_s12 = smov %s1993_s18  ;;  %27 = sbr.rel (!%p25_p0) target bundleno = 13 (0xd), region = 121 }
 0x2e6   :  { %1111 = vsyncpa [#allocation3], 1 }
 0x2e7   :  { %1113 = vsyncpa [#allocation3 + $0x1], 1 }
 0x2e8   :  { %1114 = vsyncpa [#allocation6], 1 }
 0x2e9   :  { %1115 = vsyncpa [#allocation9], 1 }
 0x2ea   :  { %1116 = vsyncpa [#allocation12], 1 }
 0x2eb   :  { %1117 = vsyncpa [#allocation4], 1 }
 0x2ec   :  { %1119 = vsyncpa [#allocation4 + $0x1], 1 }

</bundles_post_ra>
